<compile_context>
chip_gen: v7x
topology: tpu7x:2x2x1
jax: 0.10.0
libtpu: 0.0.40
codegen_flags: <defaults>
</compile_context>

<pallas_src>
import functools

import jax
import jax.numpy as jnp
from jax.experimental import pallas as pl
from jax.experimental.pallas import tpu as pltpu


def _bottleneck_kernel(x_ref, w1_ref, b1_ref, w2_ref, b2_ref, col_ref, o_ref,
                       *, H, W, add):
    """Fused Bottleneck body.

    x_ref  : (nb, C1, M)   input images, M = H*W in the lane dim (bf16)
    w1_ref : (C_, C1)      cv1 1x1 weight with BN1 scale folded in (bf16)
    b1_ref : (C_, 1)       folded BN1 bias (f32)
    w2_ref : (C2, 9*C_)    cv2 3x3 weight, BN2 scale folded, K = tap*C_ + cin (bf16)
    b2_ref : (C2, 1)       folded BN2 bias (f32)
    col_ref: (1, M)        column index of each flattened pixel (f32, exact ints)
    o_ref  : (nb, C2, M)
    """
    nb = x_ref.shape[0]
    m = H * W

    w1 = w1_ref[...]
    w2 = w2_ref[...]
    b1 = b1_ref[...]
    b2 = b2_ref[...]

    # Per-tap boundary validity (zero padding), generated in-kernel.
    # Row masks from a flat iota; column masks from the (1, M) column index.
    pos = jax.lax.broadcasted_iota(jnp.int32, (1, m), 1)
    col = col_ref[...]
    row_ok = [pos >= W, None, pos < (H - 1) * W]          # tap dy = 0, 1, 2
    col_ok = [col >= 1.0, None, col <= float(W - 2)]      # tap dx = 0, 1, 2

    for b in range(nb):                                    # static, unrolled
        x = x_ref[b]                                       # (C1, M) bf16

        # --- cv1: 1x1 conv == channel matmul + folded BN bias + LeakyReLU(0.1)
        y1 = jnp.dot(w1, x, preferred_element_type=jnp.float32) + b1
        y1 = jnp.maximum(y1, 0.1 * y1)                     # (C_, M) f32

        # --- cv2: 3x3 conv (stride 1, pad 1) as ONE matmul with K = 9*C_ -----
        # Each tap is a lane-roll of y1 on the flattened spatial axis, zeroed
        # where the tap falls outside the image, cast to bf16 and stacked.
        taps = []
        for t in range(9):
            dy, dx = t // 3, t % 3
            off = (dy - 1) * W + (dx - 1)      # flat spatial offset of this tap
            if off == 0:
                tap = y1                       # center tap: always valid
            else:
                # tap[:, p] = y1[:, p + off] (cyclic); out-of-image taps -> 0.
                tap = pltpu.roll(y1, shift=(-off) % m, axis=1)
                ok = row_ok[dy]
                if col_ok[dx] is not None:
                    ok = col_ok[dx] if ok is None else (ok & col_ok[dx])
                tap = jnp.where(ok, tap, 0.0)
            taps.append(tap.astype(jnp.bfloat16))
        stacked = jnp.concatenate(taps, axis=0)            # (9*C_, M) bf16

        y2 = jnp.dot(w2, stacked, preferred_element_type=jnp.float32) + b2
        y2 = jnp.maximum(y2, 0.1 * y2)                     # (C2, M) f32

        if add:                                 # residual (shortcut and c1==c2)
            y2 = y2 + x_ref[b].astype(jnp.float32)         # re-read; short liverange
        o_ref[b] = y2.astype(o_ref.dtype)


def bottleneck_forward(x, w1, bn1, w2, bn2, *, shortcut=True, eps=1e-5,
                       images_per_step=None, out_dtype=None):
    """Bottleneck forward (eval-mode BN folded, bf16 activations, f32 accum).

    x  : (N, C1, H, W)
    w1 : (C_, C1)         cv1 1x1 conv weight (no bias)
    bn1: (gamma, beta, running_mean, running_var), each (C_,)
    w2 : (C2, C_, 3, 3)   cv2 3x3 conv weight (no bias), groups=1
    bn2: (gamma, beta, running_mean, running_var), each (C2,)
    """
    n, c1, h, w = x.shape
    c_ = w1.shape[0]
    c2 = w2.shape[0]
    m = h * w                                # ideally a multiple of 128 (lane-dense)
    add = bool(shortcut) and (c1 == c2)
    out_dtype = x.dtype if out_dtype is None else out_dtype
    f32 = jnp.float32

    g1, bt1, mu1, v1 = bn1
    g2, bt2, mu2, v2 = bn2

    # Fold eval-mode BN into conv weights (f32 math, bf16 cast at the very end).
    s1 = g1.astype(f32) / jnp.sqrt(v1.astype(f32) + eps)                 # (C_,)
    w1_f = (w1.astype(f32) * s1[:, None]).astype(jnp.bfloat16)           # (C_, C1)
    b1 = (bt1.astype(f32) - mu1.astype(f32) * s1).reshape(c_, 1)

    s2 = g2.astype(f32) / jnp.sqrt(v2.astype(f32) + eps)                 # (C2,)
    w2_f = w2.astype(f32) * s2[:, None, None, None]                      # (C2, C_, 3, 3)
    # (C2, C_, 3, 3) -> (C2, 3, 3, C_) -> (C2, 9*C_); K index = (dy*3+dx)*C_ + cin
    w2_k = jnp.transpose(w2_f, (0, 2, 3, 1)).reshape(c2, 9 * c_).astype(jnp.bfloat16)
    b2 = (bt2.astype(f32) - mu2.astype(f32) * s2).reshape(c2, 1)

    # Column index of each flattened pixel (p mod W), exact small ints in f32.
    col = jnp.tile(jnp.arange(w, dtype=f32), (h,)).reshape(1, m)

    # NCHW -> (N, C, H*W) is a free (contiguous) reshape; bf16 halves HBM reads.
    x_flat = x.reshape(n, c1, m).astype(jnp.bfloat16)

    # Images per grid step: amortize per-step overhead for small images while
    # keeping >= 2 grid steps (v7x megacore) when the batch allows it.
    nb = images_per_step
    if nb is None:
        nb = 1
        budget = 8 * 1024 * 1024
        per_img = (c1 * 2 + c2 * jnp.dtype(out_dtype).itemsize) * m * 2
        for d in range(1, n + 1):
            if n % d == 0 and d * per_img <= budget and (n // d) >= min(2, n):
                nb = d
    assert n % nb == 0, (n, nb)

    kernel = functools.partial(_bottleneck_kernel, H=h, W=w, add=add)

    out_flat = pl.pallas_call(
        kernel,
        out_shape=jax.ShapeDtypeStruct((n, c2, m), out_dtype),
        grid_spec=pltpu.PrefetchScalarGridSpec(
            num_scalar_prefetch=0,
            grid=(n // nb,),
            in_specs=[
                pl.BlockSpec((nb, c1, m), lambda i: (i, 0, 0)),    # x (lane-dense M)
                pl.BlockSpec((c_, c1), lambda i: (0, 0)),          # w1 (folded, bf16)
                pl.BlockSpec((c_, 1), lambda i: (0, 0)),           # b1 (f32)
                pl.BlockSpec((c2, 9 * c_), lambda i: (0, 0)),      # w2 (folded, K=9*C_)
                pl.BlockSpec((c2, 1), lambda i: (0, 0)),           # b2 (f32)
                pl.BlockSpec((1, m), lambda i: (0, 0)),            # column indices
            ],
            out_specs=pl.BlockSpec((nb, c2, m), lambda i: (i, 0, 0)),
        ),
        compiler_params=pltpu.CompilerParams(
            dimension_semantics=("parallel",),
            vmem_limit_bytes=64 * 1024 * 1024),
    )(x_flat, w1_f, b1, w2_k, b2, col)

    return out_flat.reshape(n, c2, h, w)


if __name__ == "__main__":
    # Bottleneck(c1=8, c2=8, shortcut=True, g=1, e=0.5) -> c_ = 4, residual active.
    N, C1, C2, H, W = 4, 8, 8, 16, 16
    C_ = C2 // 2

    key = jax.random.PRNGKey(0)
    ks = jax.random.split(key, 11)

    x = jax.random.normal(ks[0], (N, C1, H, W), dtype=jnp.float32)

    w1 = 0.1 * jax.random.normal(ks[1], (C_, C1), dtype=jnp.float32)
    g1 = 1.0 + 0.05 * jax.random.normal(ks[2], (C_,), dtype=jnp.float32)
    bt1 = 0.05 * jax.random.normal(ks[3], (C_,), dtype=jnp.float32)
    mu1 = 0.05 * jax.random.normal(ks[4], (C_,), dtype=jnp.float32)
    v1 = 1.0 + 0.05 * jax.random.uniform(ks[5], (C_,), dtype=jnp.float32)

    w2 = 0.1 * jax.random.normal(ks[6], (C2, C_, 3, 3), dtype=jnp.float32)
    g2 = 1.0 + 0.05 * jax.random.normal(ks[7], (C2,), dtype=jnp.float32)
    bt2 = 0.05 * jax.random.normal(ks[8], (C2,), dtype=jnp.float32)
    mu2 = 0.05 * jax.random.normal(ks[9], (C2,), dtype=jnp.float32)
    v2 = 1.0 + 0.05 * jax.random.uniform(ks[10], (C2,), dtype=jnp.float32)

    out = bottleneck_forward(x, w1, (g1, bt1, mu1, v1), w2, (g2, bt2, mu2, v2),
                             shortcut=True)
    out = jax.block_until_ready(out)
    assert out.shape == (N, C2, H, W), out.shape

    # ---- plain-JAX reference (same math, bf16-quantized inputs, f32 compute) -
    eps = 1e-5
    hp = jax.lax.Precision.HIGHEST
    xq = x.astype(jnp.bfloat16).astype(jnp.float32)
    w1q = w1.astype(jnp.bfloat16).astype(jnp.float32)
    w2q = w2.astype(jnp.bfloat16).astype(jnp.float32)
    y1 = jnp.einsum("oc,nchw->nohw", w1q, xq, precision=hp)
    y1 = (y1 - mu1[None, :, None, None]) / jnp.sqrt(v1[None, :, None, None] + eps)
    y1 = y1 * g1[None, :, None, None] + bt1[None, :, None, None]
    y1 = jnp.where(y1 > 0, y1, 0.1 * y1)
    y2 = jax.lax.conv_general_dilated(
        y1, w2q, window_strides=(1, 1), padding=((1, 1), (1, 1)),
        dimension_numbers=("NCHW", "OIHW", "NCHW"), precision=hp)
    y2 = (y2 - mu2[None, :, None, None]) / jnp.sqrt(v2[None, :, None, None] + eps)
    y2 = y2 * g2[None, :, None, None] + bt2[None, :, None, None]
    y2 = jnp.where(y2 > 0, y2, 0.1 * y2)
    ref = xq + y2                                    # shortcut and c1 == c2

    err = float(jnp.max(jnp.abs(out.astype(jnp.float32) - ref)))
    assert jnp.allclose(out.astype(jnp.float32), ref, atol=1e-2, rtol=1e-2), err

    print("KERNEL_OK")
</pallas_src>

<mosaic_0001>
module attributes {stable_mosaic.version = 11 : i64} {
  func.func @_bottleneck_kernel(%arg0: i32, %arg1: memref<2x8x256xbf16, #tpu.memory_space<vmem>>, %arg2: memref<4x8xbf16, #tpu.memory_space<vmem>>, %arg3: memref<4x1xf32, #tpu.memory_space<vmem>>, %arg4: memref<8x36xbf16, #tpu.memory_space<vmem>>, %arg5: memref<8x1xf32, #tpu.memory_space<vmem>>, %arg6: memref<1x256xf32, #tpu.memory_space<vmem>>, %arg7: memref<2x8x256xf32, #tpu.memory_space<vmem>>) attributes {dimension_semantics = [#tpu.dimension_semantics<parallel>], iteration_bounds = array<i64: 2>, scalar_prefetch = 0 : i64, scratch_operands = 0 : i64, tpu.core_type = #tpu.core_type<tc>, window_params = [{transform_indices = @transform_0, window_bounds = array<i64: 2, 8, 256>}, {pipeline_mode = #tpu.pipeline_mode<synchronous>, transform_indices = @transform_1, window_bounds = array<i64: 4, 8>}, {pipeline_mode = #tpu.pipeline_mode<synchronous>, transform_indices = @transform_2, window_bounds = array<i64: 4, 1>}, {pipeline_mode = #tpu.pipeline_mode<synchronous>, transform_indices = @transform_3, window_bounds = array<i64: 8, 36>}, {pipeline_mode = #tpu.pipeline_mode<synchronous>, transform_indices = @transform_4, window_bounds = array<i64: 8, 1>}, {pipeline_mode = #tpu.pipeline_mode<synchronous>, transform_indices = @transform_5, window_bounds = array<i64: 1, 256>}, {transform_indices = @transform_6, window_bounds = array<i64: 2, 8, 256>}]} {
    %c0 = arith.constant 0 : index
    %c0_0 = arith.constant 0 : index
    %0 = vector.load %arg2[%c0, %c0_0] : memref<4x8xbf16, #tpu.memory_space<vmem>>, vector<4x8xbf16>
    %c0_1 = arith.constant 0 : index
    %c0_2 = arith.constant 0 : index
    %1 = vector.load %arg4[%c0_1, %c0_2] : memref<8x36xbf16, #tpu.memory_space<vmem>>, vector<8x36xbf16>
    %c0_3 = arith.constant 0 : index
    %c0_4 = arith.constant 0 : index
    %2 = vector.load %arg3[%c0_3, %c0_4] : memref<4x1xf32, #tpu.memory_space<vmem>>, vector<4x1xf32>
    %c0_5 = arith.constant 0 : index
    %c0_6 = arith.constant 0 : index
    %3 = vector.load %arg5[%c0_5, %c0_6] : memref<8x1xf32, #tpu.memory_space<vmem>>, vector<8x1xf32>
    %4 = tpu.iota {dimensions = array<i32: 1>} : vector<1x256xi32>
    %c0_7 = arith.constant 0 : index
    %c0_8 = arith.constant 0 : index
    %5 = vector.load %arg6[%c0_7, %c0_8] : memref<1x256xf32, #tpu.memory_space<vmem>>, vector<1x256xf32>
    %c16_i32 = arith.constant 16 : i32
    %6 = vector.broadcast %c16_i32 : i32 to vector<1x256xi32>
    %7 = arith.cmpi sge, %4, %6 : vector<1x256xi32>
    %c240_i32 = arith.constant 240 : i32
    %8 = vector.broadcast %c240_i32 : i32 to vector<1x256xi32>
    %9 = arith.cmpi slt, %4, %8 : vector<1x256xi32>
    %cst = arith.constant 1.000000e+00 : f32
    %10 = vector.broadcast %cst : f32 to vector<1x256xf32>
    %11 = arith.cmpf oge, %5, %10 : vector<1x256xf32>
    %cst_9 = arith.constant 1.400000e+01 : f32
    %12 = vector.broadcast %cst_9 : f32 to vector<1x256xf32>
    %13 = arith.cmpf ole, %5, %12 : vector<1x256xf32>
    %c0_10 = arith.constant 0 : index
    %c0_11 = arith.constant 0 : index
    %c0_12 = arith.constant 0 : index
    %14 = vector.load %arg1[%c0_10, %c0_11, %c0_12] : memref<2x8x256xbf16, #tpu.memory_space<vmem>>, vector<1x8x256xbf16>
    %15 = vector.shape_cast %14 : vector<1x8x256xbf16> to vector<8x256xbf16>
    %cst_13 = arith.constant dense<0.000000e+00> : vector<4x256xf32>
    %16 = tpu.matmul %0, %15, %cst_13 {dimension_numbers = #tpu.dot_dimension_numbers<[1], [0], [0], [1], [0, 0, 1, 1], [], []>} : vector<4x8xbf16>, vector<8x256xbf16>, vector<4x256xf32> -> vector<4x256xf32>
    %17 = vector.broadcast %2 : vector<4x1xf32> to vector<4x256xf32>
    %18 = arith.addf %16, %17 : vector<4x256xf32>
    %cst_14 = arith.constant 1.000000e-01 : f32
    %19 = vector.broadcast %cst_14 : f32 to vector<4x256xf32>
    %20 = arith.mulf %19, %18 : vector<4x256xf32>
    %21 = arith.maximumf %18, %20 : vector<4x256xf32>
    %c17_i32 = arith.constant 17 : i32
    %22 = tpu.dynamic_rotate %21 by %c17_i32 dim 1 : vector<4x256xf32>, i32 -> vector<4x256xf32>
    %23 = arith.andi %7, %11 : vector<1x256xi1>
    %cst_15 = arith.constant 0.000000e+00 : f32
    %24 = vector.shape_cast %23 : vector<1x256xi1> to vector<1x256xi1>
    %25 = vector.broadcast %24 : vector<1x256xi1> to vector<4x256xi1>
    %26 = vector.broadcast %cst_15 : f32 to vector<4x256xf32>
    %27 = arith.select %25, %22, %26 : vector<4x256xi1>, vector<4x256xf32>
    %28 = arith.truncf %27 : vector<4x256xf32> to vector<4x256xbf16>
    %c16_i32_16 = arith.constant 16 : i32
    %29 = tpu.dynamic_rotate %21 by %c16_i32_16 dim 1 : vector<4x256xf32>, i32 -> vector<4x256xf32>
    %cst_17 = arith.constant 0.000000e+00 : f32
    %30 = vector.shape_cast %7 : vector<1x256xi1> to vector<1x256xi1>
    %31 = vector.broadcast %30 : vector<1x256xi1> to vector<4x256xi1>
    %32 = vector.broadcast %cst_17 : f32 to vector<4x256xf32>
    %33 = arith.select %31, %29, %32 : vector<4x256xi1>, vector<4x256xf32>
    %34 = arith.truncf %33 : vector<4x256xf32> to vector<4x256xbf16>
    %c15_i32 = arith.constant 15 : i32
    %35 = tpu.dynamic_rotate %21 by %c15_i32 dim 1 : vector<4x256xf32>, i32 -> vector<4x256xf32>
    %36 = arith.andi %7, %13 : vector<1x256xi1>
    %cst_18 = arith.constant 0.000000e+00 : f32
    %37 = vector.shape_cast %36 : vector<1x256xi1> to vector<1x256xi1>
    %38 = vector.broadcast %37 : vector<1x256xi1> to vector<4x256xi1>
    %39 = vector.broadcast %cst_18 : f32 to vector<4x256xf32>
    %40 = arith.select %38, %35, %39 : vector<4x256xi1>, vector<4x256xf32>
    %41 = arith.truncf %40 : vector<4x256xf32> to vector<4x256xbf16>
    %c1_i32 = arith.constant 1 : i32
    %42 = tpu.dynamic_rotate %21 by %c1_i32 dim 1 : vector<4x256xf32>, i32 -> vector<4x256xf32>
    %cst_19 = arith.constant 0.000000e+00 : f32
    %43 = vector.shape_cast %11 : vector<1x256xi1> to vector<1x256xi1>
    %44 = vector.broadcast %43 : vector<1x256xi1> to vector<4x256xi1>
    %45 = vector.broadcast %cst_19 : f32 to vector<4x256xf32>
    %46 = arith.select %44, %42, %45 : vector<4x256xi1>, vector<4x256xf32>
    %47 = arith.truncf %46 : vector<4x256xf32> to vector<4x256xbf16>
    %48 = arith.truncf %21 : vector<4x256xf32> to vector<4x256xbf16>
    %c255_i32 = arith.constant 255 : i32
    %49 = tpu.dynamic_rotate %21 by %c255_i32 dim 1 : vector<4x256xf32>, i32 -> vector<4x256xf32>
    %cst_20 = arith.constant 0.000000e+00 : f32
    %50 = vector.shape_cast %13 : vector<1x256xi1> to vector<1x256xi1>
    %51 = vector.broadcast %50 : vector<1x256xi1> to vector<4x256xi1>
    %52 = vector.broadcast %cst_20 : f32 to vector<4x256xf32>
    %53 = arith.select %51, %49, %52 : vector<4x256xi1>, vector<4x256xf32>
    %54 = arith.truncf %53 : vector<4x256xf32> to vector<4x256xbf16>
    %c241_i32 = arith.constant 241 : i32
    %55 = tpu.dynamic_rotate %21 by %c241_i32 dim 1 : vector<4x256xf32>, i32 -> vector<4x256xf32>
    %56 = arith.andi %9, %11 : vector<1x256xi1>
    %cst_21 = arith.constant 0.000000e+00 : f32
    %57 = vector.shape_cast %56 : vector<1x256xi1> to vector<1x256xi1>
    %58 = vector.broadcast %57 : vector<1x256xi1> to vector<4x256xi1>
    %59 = vector.broadcast %cst_21 : f32 to vector<4x256xf32>
    %60 = arith.select %58, %55, %59 : vector<4x256xi1>, vector<4x256xf32>
    %61 = arith.truncf %60 : vector<4x256xf32> to vector<4x256xbf16>
    %c240_i32_22 = arith.constant 240 : i32
    %62 = tpu.dynamic_rotate %21 by %c240_i32_22 dim 1 : vector<4x256xf32>, i32 -> vector<4x256xf32>
    %cst_23 = arith.constant 0.000000e+00 : f32
    %63 = vector.shape_cast %9 : vector<1x256xi1> to vector<1x256xi1>
    %64 = vector.broadcast %63 : vector<1x256xi1> to vector<4x256xi1>
    %65 = vector.broadcast %cst_23 : f32 to vector<4x256xf32>
    %66 = arith.select %64, %62, %65 : vector<4x256xi1>, vector<4x256xf32>
    %67 = arith.truncf %66 : vector<4x256xf32> to vector<4x256xbf16>
    %c239_i32 = arith.constant 239 : i32
    %68 = tpu.dynamic_rotate %21 by %c239_i32 dim 1 : vector<4x256xf32>, i32 -> vector<4x256xf32>
    %69 = arith.andi %9, %13 : vector<1x256xi1>
    %cst_24 = arith.constant 0.000000e+00 : f32
    %70 = vector.shape_cast %69 : vector<1x256xi1> to vector<1x256xi1>
    %71 = vector.broadcast %70 : vector<1x256xi1> to vector<4x256xi1>
    %72 = vector.broadcast %cst_24 : f32 to vector<4x256xf32>
    %73 = arith.select %71, %68, %72 : vector<4x256xi1>, vector<4x256xf32>
    %74 = arith.truncf %73 : vector<4x256xf32> to vector<4x256xbf16>
    %75 = tpu.concatenate %28, %34, %41, %47, %48, %54, %61, %67, %74 in 0 : vector<4x256xbf16>, vector<4x256xbf16>, vector<4x256xbf16>, vector<4x256xbf16>, vector<4x256xbf16>, vector<4x256xbf16>, vector<4x256xbf16>, vector<4x256xbf16>, vector<4x256xbf16> -> vector<36x256xbf16>
    %cst_25 = arith.constant dense<0.000000e+00> : vector<8x256xf32>
    %76 = tpu.matmul %1, %75, %cst_25 {dimension_numbers = #tpu.dot_dimension_numbers<[1], [0], [0], [1], [0, 0, 1, 1], [], []>} : vector<8x36xbf16>, vector<36x256xbf16>, vector<8x256xf32> -> vector<8x256xf32>
    %77 = vector.broadcast %3 : vector<8x1xf32> to vector<8x256xf32>
    %78 = arith.addf %76, %77 : vector<8x256xf32>
    %cst_26 = arith.constant 1.000000e-01 : f32
    %79 = vector.broadcast %cst_26 : f32 to vector<8x256xf32>
    %80 = arith.mulf %79, %78 : vector<8x256xf32>
    %81 = arith.maximumf %78, %80 : vector<8x256xf32>
    %c0_27 = arith.constant 0 : index
    %c0_28 = arith.constant 0 : index
    %c0_29 = arith.constant 0 : index
    %82 = vector.load %arg1[%c0_27, %c0_28, %c0_29] : memref<2x8x256xbf16, #tpu.memory_space<vmem>>, vector<1x8x256xbf16>
    %83 = vector.shape_cast %82 : vector<1x8x256xbf16> to vector<8x256xbf16>
    %84 = arith.extf %83 : vector<8x256xbf16> to vector<8x256xf32>
    %85 = arith.addf %81, %84 : vector<8x256xf32>
    %c0_30 = arith.constant 0 : index
    %c0_31 = arith.constant 0 : index
    %c0_32 = arith.constant 0 : index
    %86 = vector.load %arg7[%c0_30, %c0_31, %c0_32] : memref<2x8x256xf32, #tpu.memory_space<vmem>>, vector<1x8x256xf32>
    %87 = vector.shape_cast %86 : vector<1x8x256xf32> to vector<8x256xf32>
    %88 = vector.shape_cast %85 : vector<8x256xf32> to vector<1x8x256xf32>
    tpu.vector_store %arg7[%c0_30, %c0_31, %c0_32], %88 {strides = array<i32>} : memref<2x8x256xf32, #tpu.memory_space<vmem>>, vector<1x8x256xf32>,
    %c1 = arith.constant 1 : index
    %c0_33 = arith.constant 0 : index
    %c0_34 = arith.constant 0 : index
    %89 = vector.load %arg1[%c1, %c0_33, %c0_34] : memref<2x8x256xbf16, #tpu.memory_space<vmem>>, vector<1x8x256xbf16>
    %90 = vector.shape_cast %89 : vector<1x8x256xbf16> to vector<8x256xbf16>
    %cst_35 = arith.constant dense<0.000000e+00> : vector<4x256xf32>
    %91 = tpu.matmul %0, %90, %cst_35 {dimension_numbers = #tpu.dot_dimension_numbers<[1], [0], [0], [1], [0, 0, 1, 1], [], []>} : vector<4x8xbf16>, vector<8x256xbf16>, vector<4x256xf32> -> vector<4x256xf32>
    %92 = vector.broadcast %2 : vector<4x1xf32> to vector<4x256xf32>
    %93 = arith.addf %91, %92 : vector<4x256xf32>
    %cst_36 = arith.constant 1.000000e-01 : f32
    %94 = vector.broadcast %cst_36 : f32 to vector<4x256xf32>
    %95 = arith.mulf %94, %93 : vector<4x256xf32>
    %96 = arith.maximumf %93, %95 : vector<4x256xf32>
    %c17_i32_37 = arith.constant 17 : i32
    %97 = tpu.dynamic_rotate %96 by %c17_i32_37 dim 1 : vector<4x256xf32>, i32 -> vector<4x256xf32>
    %98 = arith.andi %7, %11 : vector<1x256xi1>
    %cst_38 = arith.constant 0.000000e+00 : f32
    %99 = vector.shape_cast %98 : vector<1x256xi1> to vector<1x256xi1>
    %100 = vector.broadcast %99 : vector<1x256xi1> to vector<4x256xi1>
    %101 = vector.broadcast %cst_38 : f32 to vector<4x256xf32>
    %102 = arith.select %100, %97, %101 : vector<4x256xi1>, vector<4x256xf32>
    %103 = arith.truncf %102 : vector<4x256xf32> to vector<4x256xbf16>
    %c16_i32_39 = arith.constant 16 : i32
    %104 = tpu.dynamic_rotate %96 by %c16_i32_39 dim 1 : vector<4x256xf32>, i32 -> vector<4x256xf32>
    %cst_40 = arith.constant 0.000000e+00 : f32
    %105 = vector.shape_cast %7 : vector<1x256xi1> to vector<1x256xi1>
    %106 = vector.broadcast %105 : vector<1x256xi1> to vector<4x256xi1>
    %107 = vector.broadcast %cst_40 : f32 to vector<4x256xf32>
    %108 = arith.select %106, %104, %107 : vector<4x256xi1>, vector<4x256xf32>
    %109 = arith.truncf %108 : vector<4x256xf32> to vector<4x256xbf16>
    %c15_i32_41 = arith.constant 15 : i32
    %110 = tpu.dynamic_rotate %96 by %c15_i32_41 dim 1 : vector<4x256xf32>, i32 -> vector<4x256xf32>
    %111 = arith.andi %7, %13 : vector<1x256xi1>
    %cst_42 = arith.constant 0.000000e+00 : f32
    %112 = vector.shape_cast %111 : vector<1x256xi1> to vector<1x256xi1>
    %113 = vector.broadcast %112 : vector<1x256xi1> to vector<4x256xi1>
    %114 = vector.broadcast %cst_42 : f32 to vector<4x256xf32>
    %115 = arith.select %113, %110, %114 : vector<4x256xi1>, vector<4x256xf32>
    %116 = arith.truncf %115 : vector<4x256xf32> to vector<4x256xbf16>
    %c1_i32_43 = arith.constant 1 : i32
    %117 = tpu.dynamic_rotate %96 by %c1_i32_43 dim 1 : vector<4x256xf32>, i32 -> vector<4x256xf32>
    %cst_44 = arith.constant 0.000000e+00 : f32
    %118 = vector.shape_cast %11 : vector<1x256xi1> to vector<1x256xi1>
    %119 = vector.broadcast %118 : vector<1x256xi1> to vector<4x256xi1>
    %120 = vector.broadcast %cst_44 : f32 to vector<4x256xf32>
    %121 = arith.select %119, %117, %120 : vector<4x256xi1>, vector<4x256xf32>
    %122 = arith.truncf %121 : vector<4x256xf32> to vector<4x256xbf16>
    %123 = arith.truncf %96 : vector<4x256xf32> to vector<4x256xbf16>
    %c255_i32_45 = arith.constant 255 : i32
    %124 = tpu.dynamic_rotate %96 by %c255_i32_45 dim 1 : vector<4x256xf32>, i32 -> vector<4x256xf32>
    %cst_46 = arith.constant 0.000000e+00 : f32
    %125 = vector.shape_cast %13 : vector<1x256xi1> to vector<1x256xi1>
    %126 = vector.broadcast %125 : vector<1x256xi1> to vector<4x256xi1>
    %127 = vector.broadcast %cst_46 : f32 to vector<4x256xf32>
    %128 = arith.select %126, %124, %127 : vector<4x256xi1>, vector<4x256xf32>
    %129 = arith.truncf %128 : vector<4x256xf32> to vector<4x256xbf16>
    %c241_i32_47 = arith.constant 241 : i32
    %130 = tpu.dynamic_rotate %96 by %c241_i32_47 dim 1 : vector<4x256xf32>, i32 -> vector<4x256xf32>
    %131 = arith.andi %9, %11 : vector<1x256xi1>
    %cst_48 = arith.constant 0.000000e+00 : f32
    %132 = vector.shape_cast %131 : vector<1x256xi1> to vector<1x256xi1>
    %133 = vector.broadcast %132 : vector<1x256xi1> to vector<4x256xi1>
    %134 = vector.broadcast %cst_48 : f32 to vector<4x256xf32>
    %135 = arith.select %133, %130, %134 : vector<4x256xi1>, vector<4x256xf32>
    %136 = arith.truncf %135 : vector<4x256xf32> to vector<4x256xbf16>
    %c240_i32_49 = arith.constant 240 : i32
    %137 = tpu.dynamic_rotate %96 by %c240_i32_49 dim 1 : vector<4x256xf32>, i32 -> vector<4x256xf32>
    %cst_50 = arith.constant 0.000000e+00 : f32
    %138 = vector.shape_cast %9 : vector<1x256xi1> to vector<1x256xi1>
    %139 = vector.broadcast %138 : vector<1x256xi1> to vector<4x256xi1>
    %140 = vector.broadcast %cst_50 : f32 to vector<4x256xf32>
    %141 = arith.select %139, %137, %140 : vector<4x256xi1>, vector<4x256xf32>
    %142 = arith.truncf %141 : vector<4x256xf32> to vector<4x256xbf16>
    %c239_i32_51 = arith.constant 239 : i32
    %143 = tpu.dynamic_rotate %96 by %c239_i32_51 dim 1 : vector<4x256xf32>, i32 -> vector<4x256xf32>
    %144 = arith.andi %9, %13 : vector<1x256xi1>
    %cst_52 = arith.constant 0.000000e+00 : f32
    %145 = vector.shape_cast %144 : vector<1x256xi1> to vector<1x256xi1>
    %146 = vector.broadcast %145 : vector<1x256xi1> to vector<4x256xi1>
    %147 = vector.broadcast %cst_52 : f32 to vector<4x256xf32>
    %148 = arith.select %146, %143, %147 : vector<4x256xi1>, vector<4x256xf32>
    %149 = arith.truncf %148 : vector<4x256xf32> to vector<4x256xbf16>
    %150 = tpu.concatenate %103, %109, %116, %122, %123, %129, %136, %142, %149 in 0 : vector<4x256xbf16>, vector<4x256xbf16>, vector<4x256xbf16>, vector<4x256xbf16>, vector<4x256xbf16>, vector<4x256xbf16>, vector<4x256xbf16>, vector<4x256xbf16>, vector<4x256xbf16> -> vector<36x256xbf16>
    %cst_53 = arith.constant dense<0.000000e+00> : vector<8x256xf32>
    %151 = tpu.matmul %1, %150, %cst_53 {dimension_numbers = #tpu.dot_dimension_numbers<[1], [0], [0], [1], [0, 0, 1, 1], [], []>} : vector<8x36xbf16>, vector<36x256xbf16>, vector<8x256xf32> -> vector<8x256xf32>
    %152 = vector.broadcast %3 : vector<8x1xf32> to vector<8x256xf32>
    %153 = arith.addf %151, %152 : vector<8x256xf32>
    %cst_54 = arith.constant 1.000000e-01 : f32
    %154 = vector.broadcast %cst_54 : f32 to vector<8x256xf32>
    %155 = arith.mulf %154, %153 : vector<8x256xf32>
    %156 = arith.maximumf %153, %155 : vector<8x256xf32>
    %c1_55 = arith.constant 1 : index
    %c0_56 = arith.constant 0 : index
    %c0_57 = arith.constant 0 : index
    %157 = vector.load %arg1[%c1_55, %c0_56, %c0_57] : memref<2x8x256xbf16, #tpu.memory_space<vmem>>, vector<1x8x256xbf16>
    %158 = vector.shape_cast %157 : vector<1x8x256xbf16> to vector<8x256xbf16>
    %159 = arith.extf %158 : vector<8x256xbf16> to vector<8x256xf32>
    %160 = arith.addf %156, %159 : vector<8x256xf32>
    %c1_58 = arith.constant 1 : index
    %c0_59 = arith.constant 0 : index
    %c0_60 = arith.constant 0 : index
    %161 = vector.load %arg7[%c1_58, %c0_59, %c0_60] : memref<2x8x256xf32, #tpu.memory_space<vmem>>, vector<1x8x256xf32>
    %162 = vector.shape_cast %161 : vector<1x8x256xf32> to vector<8x256xf32>
    %163 = vector.shape_cast %160 : vector<8x256xf32> to vector<1x8x256xf32>
    tpu.vector_store %arg7[%c1_58, %c0_59, %c0_60], %163 {strides = array<i32>} : memref<2x8x256xf32, #tpu.memory_space<vmem>>, vector<1x8x256xf32>,
    return
  }
  func.func @transform_0(%arg0: i32) -> (i32, i32, i32) {
    %c0_i32 = arith.constant 0 : i32
    %c0_i32_0 = arith.constant 0 : i32
    %c0_i32_1 = arith.constant 0 : i32
    return %arg0, %c0_i32, %c0_i32_0 : i32, i32, i32
  }
  func.func @transform_1(%arg0: i32) -> (i32, i32) {
    %c0_i32 = arith.constant 0 : i32
    %c0_i32_0 = arith.constant 0 : i32
    %c0_i32_1 = arith.constant 0 : i32
    return %c0_i32, %c0_i32_0 : i32, i32
  }
  func.func @transform_2(%arg0: i32) -> (i32, i32) {
    %c0_i32 = arith.constant 0 : i32
    %c0_i32_0 = arith.constant 0 : i32
    %c0_i32_1 = arith.constant 0 : i32
    return %c0_i32, %c0_i32_0 : i32, i32
  }
  func.func @transform_3(%arg0: i32) -> (i32, i32) {
    %c0_i32 = arith.constant 0 : i32
    %c0_i32_0 = arith.constant 0 : i32
    %c0_i32_1 = arith.constant 0 : i32
    return %c0_i32, %c0_i32_0 : i32, i32
  }
  func.func @transform_4(%arg0: i32) -> (i32, i32) {
    %c0_i32 = arith.constant 0 : i32
    %c0_i32_0 = arith.constant 0 : i32
    %c0_i32_1 = arith.constant 0 : i32
    return %c0_i32, %c0_i32_0 : i32, i32
  }
  func.func @transform_5(%arg0: i32) -> (i32, i32) {
    %c0_i32 = arith.constant 0 : i32
    %c0_i32_0 = arith.constant 0 : i32
    %c0_i32_1 = arith.constant 0 : i32
    return %c0_i32, %c0_i32_0 : i32, i32
  }
  func.func @transform_6(%arg0: i32) -> (i32, i32, i32) {
    %c0_i32 = arith.constant 0 : i32
    %c0_i32_0 = arith.constant 0 : i32
    %c0_i32_1 = arith.constant 0 : i32
    return %arg0, %c0_i32, %c0_i32_0 : i32, i32, i32
  }
}

</mosaic_0001>

<bundles_post_ra>
// kernel: tpu_custom_call.1
= control target key start
LH: loop header
LB: loop body
LE: loop exit
PB: predicated region body
PF: predicated region fallthrough
CT: control target
= control target key end

     0   :  { %11 = vsyncpa [#allocation3], 0  ;;  %s2324_s0 = inlined_call_operand.hbm [shape: bf16[4,8,256], index: 0, kind: input, shape index: {}]   ;;  %s2325_s1 = inlined_call_operand.hbm [shape: bf16[4,8], index: 1, kind: input, shape index: {}]   ;;  %s2326_s2 = inlined_call_operand.hbm [shape: f32[4,1], index: 2, kind: input, shape index: {}]   ;;  %s2327_s3 = inlined_call_operand.hbm [shape: bf16[8,36], index: 3, kind: input, shape index: {}]   ;;  %s2328_s4 = inlined_call_operand.hbm [shape: f32[8,1], index: 4, kind: input, shape index: {}]   ;;  %s2329_s5 = inlined_call_operand.hbm [shape: f32[1,256], index: 5, kind: input, shape index: {}]   ;;  %s2330_s6 = inlined_call_operand.hbm [shape: f32[4,8,256], index: 6, kind: output, shape index: {}]  }
   0x1   :  { %13 = vsyncpa [#allocation3 + $0x1], 0 }
   0x2   :  { %14 = vsyncpa [#allocation6], 0 }
   0x3   :  { %15 = vsyncpa [#allocation9], 0 }
   0x4   :  { %16 = vsyncpa [#allocation12], 0 }
   0x5   :  { %17 = vsyncpa [#allocation4], 0 }
   0x6   :  { %19 = vsyncpa [#allocation4 + $0x1], 0  ;;  %s1656_s21 = smov 0   ;;  %s1658_s22 = smov 0  }
   0x7   :  { %s1660_s23 = smov 0   ;;  %s1662_s24 = smov 0  }
   0x8 LB: > { %s1602_s25 = smov [#allocation5]   ;;  %s1677_s27 = sadd.s32 4294967295, %s1600_s24   ;;  %s1600_s24 = sphi %s1662_s24, %s2373_s24   ;;  %s1596_s23 = sphi %s1660_s23, %s2372_s23   ;;  %s1592_s22 = sphi %s1658_s22, %s2371_s22   ;;  %s1588_s21 = sphi %s1656_s21, %s2370_s21  }
   0x9   : > { %s200_s26 = sshll.u32 %s1602_s25, 4  ;;  %p1113_p0 = scmp.ge.s32.totalorder %s1600_s24, 1  ;;  %s1682_s26 = int_to_ptr.vmem [resolvable:$true] %s200_s26 }
   0xa   : > { %p2331_p1 = scmp.eq.s32.totalorder %s1677_s27, 0  ;;  %p187_p2 = scmp.lt.s32.totalorder %s1600_s24, 3 }
   0xb   : > { %s1603_s29 = smov [#allocation8]   ;;  %s1604_s7 = smov [#allocation7]  }
   0xc   : > { %p1684_p3 = pnand %p1113_p0, %p187_p2  ;;  %s222_s30 = sshll.u32 %s1603_s29, 4  ;;  %s1691_s30 = int_to_ptr.vmem [resolvable:$true] %s222_s30 }
   0xd   : > { %s211_s8 = sshll.u32 %s1604_s7, 4  ;;  %s1605_s10 = smov [#allocation10]   ;;  %s1699_s8 = int_to_ptr.vmem [resolvable:$true] %s211_s8 }
   0xe   : > { %s2334_s28 = scalar_select %p1684_p3, 1, 0 }
   0xf   : > { %p1181_p5 = pneg %p1684_p3  ;;  %s1701_s11 = sshll.u32 %s1605_s10, 4  ;;  %s234_s11 = int_to_ptr.vmem [resolvable:$true] %s1701_s11 }
  0x10   : > { %s1352_s14 = scalar_lea.hbm %s2325_s1, 32 }
  0x11   : > { %p1695_p6 = pnand %p1181_p5, %p2331_p1  ;;  %p1353_p7 = scmp.ne.s32.totalorder %s2325_s1, %s1352_s14 }
  0x12   : > { %p1359_p11 = scmp.lt.u32.totalorder %s1352_s14, %s2325_s1 }
  0x13   : > { %p1711_p8 = pneg %p1695_p6 }
  0x15   : > { %p1355_p9 = pnand %p1711_p8, %p1353_p7 }
  0x17   : > { %p1356_p10 = pneg %p1355_p9 }
  0x19   : > { %p1361_p12 = pnand %p1359_p11, %p1356_p10 }
  0x1b   : > { %1364 = shalt.err (!%p1361_p12)
}
  0x1c   : > { %s1365_s20 = scalar_lea.vmem %s1682_s26, 32  ;;  %p1373_p5 = scmp.lt.s32.totalorder %s1682_s26, %s1682_s26 }
  0x1d   : > { %p1366_p13 = scmp.ne.s32.totalorder %s1682_s26, %s1365_s20  ;;  %p1374_p4 = scmp.lt.s32.totalorder %s1365_s20, %s1365_s20 }
  0x1f   : > { %p1368_p0 = pnand %p1366_p13, %p1711_p8  ;;  %p1375_p7 = por %p1374_p4, %p1373_p5 }
  0x21   : > { %p1369_p2 = pneg %p1368_p0 }
  0x23   : > { %p1376_p9 = pnand %p1375_p7, %p1369_p2 }
  0x25   : > { %1379 = shalt.err (!%p1376_p9)
}
  0x26   : > { %1184 = dma.hbm_to_vmem [thread:$0]  (!%p1695_p6), %s2325_s1, 32, %s1682_s26, [#allocation6]  }
  0x27   : > { %s1380_s12 = scalar_lea.hbm %s2327_s3, 64 }
  0x28   : > { %p1381_p10 = scmp.ne.s32.totalorder %s2327_s3, %s1380_s12  ;;  %p1387_p12 = scmp.lt.u32.totalorder %s1380_s12, %s2327_s3 }
  0x2a   : > { %p1383_p4 = pnand %p1381_p10, %p1711_p8 }
  0x2c   : > { %p1384_p11 = pneg %p1383_p4 }
  0x2e   : > { %p1389_p13 = pnand %p1387_p12, %p1384_p11 }
  0x30   : > { %1392 = shalt.err (!%p1389_p13)
}
  0x31   : > { %s1393_s26 = scalar_lea.vmem %s1691_s30, 64  ;;  %p1401_p7 = scmp.lt.s32.totalorder %s1691_s30, %s1691_s30 }
  0x32   : > { %p1394_p0 = scmp.ne.s32.totalorder %s1691_s30, %s1393_s26  ;;  %p1402_p9 = scmp.lt.s32.totalorder %s1393_s26, %s1393_s26 }
  0x34   : > { %p1396_p2 = pnand %p1394_p0, %p1711_p8  ;;  %p1403_p10 = por %p1402_p9, %p1401_p7 }
  0x36   : > { %p1397_p5 = pneg %p1396_p2 }
  0x38   : > { %p1404_p4 = pnand %p1403_p10, %p1397_p5 }
  0x3a   : > { %1407 = shalt.err (!%p1404_p4)
}
  0x3b   : > { %1190 = dma.hbm_to_vmem [thread:$0]  (!%p1695_p6), %s2327_s3, 64, %s1691_s30, [#allocation9]  }
  0x3c   : > { %s1408_s29 = scalar_lea.hbm %s2326_s2, 64 }
  0x3d   : > { %p1409_p11 = scmp.ne.s32.totalorder %s2326_s2, %s1408_s29  ;;  %p1415_p0 = scmp.lt.u32.totalorder %s1408_s29, %s2326_s2 }
  0x3f   : > { %p1411_p12 = pnand %p1409_p11, %p1711_p8 }
  0x41   : > { %p1412_p13 = pneg %p1411_p12 }
  0x43   : > { %p1417_p2 = pnand %p1415_p0, %p1412_p13 }
  0x45   : > { %1420 = shalt.err (!%p1417_p2)
}
  0x46   : > { %s1421_s30 = scalar_lea.vmem %s1699_s8, 64  ;;  %p1429_p10 = scmp.lt.s32.totalorder %s1699_s8, %s1699_s8 }
  0x47   : > { %p1422_p5 = scmp.ne.s32.totalorder %s1699_s8, %s1421_s30  ;;  %p1430_p4 = scmp.lt.s32.totalorder %s1421_s30, %s1421_s30 }
  0x49   : > { %p1424_p7 = pnand %p1422_p5, %p1711_p8  ;;  %p1431_p11 = por %p1430_p4, %p1429_p10 }
  0x4b   : > { %p1425_p9 = pneg %p1424_p7 }
  0x4d   : > { %p1432_p12 = pnand %p1431_p11, %p1425_p9 }
  0x4f   : > { %1435 = shalt.err (!%p1432_p12)
}
  0x50   : > { %1187 = dma.hbm_to_vmem [thread:$0]  (!%p1695_p6), %s2326_s2, 64, %s1699_s8, [#allocation6]  }
  0x51   : > { %s1606_s16 = smov [#allocation11]   ;;  %s1436_s20 = scalar_lea.hbm %s2328_s4, 128 }
  0x52   : > { %s244_s26 = sshll.u32 %s1606_s16, 4  ;;  %p1437_p13 = scmp.ne.s32.totalorder %s2328_s4, %s1436_s20  ;;  %s245_s26 = int_to_ptr.vmem [resolvable:$true] %s244_s26 }
  0x53   : > { %p1443_p5 = scmp.lt.u32.totalorder %s1436_s20, %s2328_s4 }
  0x54   : > { %p1439_p0 = pnand %p1437_p13, %p1711_p8 }
  0x56   : > { %p1440_p2 = pneg %p1439_p0 }
  0x58   : > { %p1445_p7 = pnand %p1443_p5, %p1440_p2 }
  0x5a   : > { %1448 = shalt.err (!%p1445_p7)
}
  0x5b   : > { %s1449_s8 = scalar_lea.vmem %s234_s11, 128  ;;  %p1457_p11 = scmp.lt.s32.totalorder %s234_s11, %s234_s11 }
  0x5c   : > { %p1450_p9 = scmp.ne.s32.totalorder %s234_s11, %s1449_s8  ;;  %p1458_p12 = scmp.lt.s32.totalorder %s1449_s8, %s1449_s8 }
  0x5e   : > { %p1452_p10 = pnand %p1450_p9, %p1711_p8  ;;  %p1459_p1 = por %p1458_p12, %p1457_p11 }
  0x60   : > { %p1453_p4 = pneg %p1452_p10 }
  0x62   : > { %p1460_p3 = pnand %p1459_p1, %p1453_p4 }
  0x64   : > { %1463 = shalt.err (!%p1460_p3)
}
  0x65   : > { %1193 = dma.hbm_to_vmem [thread:$0]  (!%p1695_p6), %s2328_s4, 128, %s234_s11, [#allocation9]  }
  0x66   : > { %s1464_s15 = scalar_lea.hbm %s2329_s5, 32 }
  0x67   : > { %p1465_p13 = scmp.ne.s32.totalorder %s2329_s5, %s1464_s15  ;;  %p1471_p3 = scmp.lt.u32.totalorder %s1464_s15, %s2329_s5 }
  0x69   : > { %p1467_p0 = pnand %p1465_p13, %p1711_p8 }
  0x6b   : > { %p1468_p1 = pneg %p1467_p0 }
  0x6d   : > { %p1473_p2 = pnand %p1471_p3, %p1468_p1 }
  0x6f   : > { %1476 = shalt.err (!%p1473_p2)
}
  0x70   : > { %s1477_s25 = scalar_lea.vmem %s245_s26, 32  ;;  %p1485_p10 = scmp.lt.s32.totalorder %s245_s26, %s245_s26 }
  0x71   : > { %p1478_p5 = scmp.ne.s32.totalorder %s245_s26, %s1477_s25  ;;  %p1486_p4 = scmp.lt.s32.totalorder %s1477_s25, %s1477_s25 }
  0x73   : > { %p1480_p7 = pnand %p1478_p5, %p1711_p8  ;;  %p1487_p11 = por %p1486_p4, %p1485_p10 }
  0x75   : > { %p1481_p9 = pneg %p1480_p7 }
  0x77   : > { %p1488_p12 = pnand %p1487_p11, %p1481_p9 }
  0x79   : > { %1491 = shalt.err (!%p1488_p12)
}
  0x7a   : > { %1196 = dma.hbm_to_vmem [thread:$0]  (!%p1695_p6), %s2329_s5, 32, %s245_s26, [#allocation12]  }
  0x7b   : > { %s1112_s17 = sadd.s32 4294967294, %s1600_s24   ;;  %s1817_s9 = sadd.s32 1, %s1600_s24  }
  0x7c   : > { %s32_s7 = sadd.s32 1, %s1596_s23  ;;  %s29_s10 = ssub.s32 %s1600_s24, %s1817_s9 }
  0x7d   : > { %p39_p8 = scmp.ne.s32.totalorder %s1596_s23, %s1592_s22  ;;  %p30_p13 = scmp.eq.s32.totalorder %s29_s10, 0 }
  0x7e   : > { %p40_p0 = scmp.eq.s32.totalorder %s1600_s24, 0  ;;  %p45_p1 = scmp.ne.s32.totalorder %s1592_s22, %s1588_s21 }
  0x7f   : > { %p174_p3 = scmp.eq.s32.totalorder %s1677_s27, 1  ;;  %p2337_p5 = scmp.eq.s32.totalorder %s1677_s27, 0 }
  0x80   : > { %s1829_s8 = scalar_select %p30_p13, %s1596_s23, %s32_s7  }
  0x81   : > { %p41_p2 = por %p40_p0, %p39_p8  ;;  %p1833_p7 = por %p2337_p5, %p45_p1 }
  0x82   : > { %p1837_p6 = por %p174_p3, %p39_p8  ;;  %p180_p9 = scmp.eq.s32.totalorder %s1112_s17, 1 }
  0x83   : > { %p1210_p10 = scmp.lt.s32.totalorder %s1600_s24, 2  ;;  %s255_s13 = sand.u32 1, %s1596_s23  }
  0x84   : > { %s2339_s26 = scalar_select %p1837_p6, 1, 0 }
  0x85   : > { %p1843_p4 = por %p180_p9, %p45_p1  ;;  %s1120_s14 = sshll.u32 %s255_s13, 4 }
  0x86   : > { %s1154_s15 = sshll.u32 %s1600_s24, 8  ;;  %s259_s20 = scalar_lea.vmem [#allocation2], %s1120_s14 }
  0x87   : > { %s2340_s30 = scalar_select %p1843_p4, 1, 0 }
  0x88   : > { %s1851_s19 = scalar_lea.hbm %s2324_s0, %s1154_s15  ;;  %s267_s25 = sshll.u32 %s259_s20, 4  ;;  %s1857_s25 = int_to_ptr.vmem [resolvable:$true] %s267_s25 }
  0x89   : > { %p1853_p11 = pnand %p1210_p10, %p41_p2  ;;  %s1859_s29 = scalar_lea.sflag [#allocation3], %s255_s13 }
  0x8a   : > { %s1492_s17 = scalar_lea.hbm %s1851_s19, 256  ;;  %s1497_s14 = scalar_lea.hbm %s2324_s0, 512 }
  0x8b   : > { %p1493_p12 = scmp.ne.s32.totalorder %s1851_s19, %s1492_s17  ;;  %p1494_p8 = pneg %p1853_p11 }
  0x8c   : > { %p1498_p1 = scmp.lt.u32.totalorder %s1851_s19, %s2324_s0  ;;  %p1499_p3 = scmp.lt.u32.totalorder %s1497_s14, %s1492_s17 }
  0x8d   : > { %p1495_p13 = pnand %p1494_p8, %p1493_p12  ;;  %p1501_p5 = scmp.lt.u32.totalorder %s1492_s17, %s1851_s19 }
  0x8e   : > { %p1500_p2 = por %p1499_p3, %p1498_p1 }
  0x8f   : > { %p1496_p0 = pneg %p1495_p13 }
  0x90   : > { %p1502_p9 = por %p1501_p5, %p1500_p2 }
  0x92   : > { %p1503_p10 = pnand %p1502_p9, %p1496_p0 }
  0x94   : > { %1506 = shalt.err (!%p1503_p10)
}
  0x95   : > { %s1507_s13 = scalar_lea.vmem %s1857_s25, 256  ;;  %s1607_s18 = smov [#allocation2]  }
  0x96   : > { %p1508_p12 = scmp.ne.s32.totalorder %s1857_s25, %s1507_s13  ;;  %s1512_s20 = sshll.u32 %s1607_s18, 4  ;;  %s1513_s20 = int_to_ptr.vmem [resolvable:$false] %s1512_s20 }
  0x97   : > { %s1514_s7 = scalar_lea.vmem %s1513_s20, 512  ;;  %p1515_p6 = scmp.lt.s32.totalorder %s1857_s25, %s1513_s20 }
  0x98   : > { %p1510_p13 = pnand %p1508_p12, %p1494_p8  ;;  %p1516_p1 = scmp.lt.s32.totalorder %s1514_s7, %s1507_s13 }
  0x9a   : > { %p1511_p4 = pneg %p1510_p13  ;;  %p1517_p3 = por %p1516_p1, %p1515_p6 }
  0x9c   : > { %p1518_p2 = pnand %p1517_p3, %p1511_p4 }
  0x9e   : > { %1521 = shalt.err (!%p1518_p2)
}
  0x9f   : > { %s1608_s17 = smov 128   ;;  %s1609_s10 = smov 8  }
  0xa0   : > { %1200 = dma.hbm_to_vmem [thread:$0]  (!%p1853_p11), %s1851_s19, 256, %s1857_s25, %s1859_s29, %s1608_s17, %s1608_s17, %s1609_s10  }
  0xa1   : > { %p2342_p8 = scmp.ne.s32.totalorder %s2334_s28, 0 }
  0xa2   : > { %s1890_s14 = sand.u32 (!%p2342_p8), 1, %s1592_s22  }
  0xa3   : > { %279 = sbr.rel (%p2342_p8) target bundleno = 814 (0x32e), region = 44  ;;  %s1125_s15 = sshll.u32 (!%p2342_p8), %s1890_s14, 4 }
  0xa4   : > { %s282_s16 = scalar_lea.sflag (!%p2342_p8), [#allocation3], %s1890_s14  ;;  %s285_s13 = scalar_lea.vmem (!%p2342_p8), [#allocation2], %s1125_s15 }
  0xaa   : > { %1567 = dma.done.wait (%p1833_p7), %s282_s16, 256  }
  0xab   : > { %1569 = vsyncadd (%p1833_p7), %s282_s16, 4294967040  ;;  %p2343_p6 = scmp.eq.s32.totalorder %s1677_s27, 0 }
  0xad   : > { %1571 = dma.done.wait (%p2343_p6), [#allocation6], 96   ;;  %p2344_p4 = pmov %p2343_p6 }
  0xaf   : > { %1573 = vsyncadd (%p2344_p4), [#allocation6], 4294967200  ;;  %p2345_p11 = pmov %p2344_p4 }
  0xb0   : > { %p2346_p0 = pmov %p2344_p4 }
  0xb1   : > { %1575 = dma.done.wait (%p2345_p11), [#allocation9], 192  }
  0xb2   : > { %1577 = vsyncadd (%p2346_p0), [#allocation9], 4294967104  ;;  %p2347_p5 = pmov %p2346_p0 }
  0xb3   : > { %p2348_p9 = pmov %p2346_p0 }
  0xb4   : > { %1579 = dma.done.wait (%p2347_p5), [#allocation12], 32  }
  0xb5   : > { %1581 = vsyncadd (%p2348_p9), [#allocation12], 4294967264  ;;  %v1610_v0 = vmov 0   ;;  %v1914_v1 = vld [vmem:[%s285_s13] sm:$0xff]  ;;  %vm366_vm0 = vcmask 1043456   ;;  %v1916_v2 = vld [vmem:[%s285_s13 + $0x8] sm:$0xff]  ;;  %v341_v35 = vlaneseq }
  0xb6   : > { %405 = vmatprep.mubr.bf16.mxu1 %v1610_v0  ;;  %767 = vmatprep.mubr.bf16.mxu0 %v1610_v0  ;;  %v1133_v3 = vcombine.high %v1914_v1, %v1914_v1  ;;  %v1140_v4 = vcombine.high %v1916_v2, %v1916_v2  ;;  %v1132_v5 = vcombine.low %v1914_v1, %v1914_v1  ;;  %v339_v7 = vld [vmem:[#allocation7] sm:$0xf]  ;;  %v337_v10 = vld [vmem:[#allocation5] sm:$0x3]  ;;  %vm362_vm1 = vcmask 64512   ;;  %s1611_s28 = smov 15  }
  0xb7   : > { %1266 = vset.pattern.permute.xlu0 %v1610_v0  ;;  %1347 = vset.pattern.permute.xlu1 %v1610_v0  ;;  %v1139_v6 = vcombine.low %v1916_v2, %v1916_v2  ;;  %s1612_s12 = smov 16   ;;  %s1613_s19 = smov 17   ;;  %v340_v34 = vld [vmem:[#allocation10] sm:$0xff]  ;;  %v344_v36 = vld [vmem:[#allocation11] sm:$0x3]  ;;  %v427_v37 = vshrl.u32 %v341_v35, 7 }
  0xb8   : > { %354 = vperm.xlu0 %1266, %v339_v7   ;;  %1134 = vmatprep.subr.msk.bf16.mxu1 %vm366_vm0, %v1133_v3  ;;  %v368_v8 = vsel %vm366_vm0, %v1132_v5, 0  ;;  %s1614_s25 = smov 1   ;;  %s1615_s11 = smov 127   ;;  %vm350_vm2 = vcmp.le.f32.partialorder %v344_v36, 14.0  ;;  %vm349_vm3 = vcmp.ge.f32.partialorder %v344_v36, 1.0  ;;  %v1949_v41 = vand.u32 127, %v341_v35 }
  0xb9   : > { %1141 = vmatprep.subr.msk.bf16.mxu0 %vm366_vm0, %v1140_v4  ;;  %v730_v9 = vsel %vm366_vm0, %v1139_v6, 0  ;;  %374 = vmatpush1.bf16.msra.mxu1 %v368_v8  ;;  %s1616_s29 = smov 113   ;;  %s1617_s18 = smov 112   ;;  %v1946_v38 = vsub.s32 0, %v427_v37  ;;  %v476_v39 = vsel %vm350_vm2, 1, %v1610_v0  ;;  %v432_v40 = vsub.s32 1, %v427_v37 }
  0xba   : > { %736 = vmatpush1.bf16.msra.mxu0 %v730_v9  ;;  %s1618_s20 = smov 111   ;;  %v425_v43 = vsel %vm349_vm3, 1, %v1610_v0  ;;  %vm345_vm4 = vcmp.ge.s32.totalorder %v1949_v41, 16  ;;  %v1971_v47 = vadd.s32 128, %v1949_v41  ;;  %vm473_vm12 = vcmp.lt.s32.totalorder %v1949_v41, 15  ;;  %s1131_s7 = sshll.u32 %s1890_s14, 5 }
  0xbb   : > { %v1952_v42 = vrot.slane %v476_v39, %v1946_v38  ;;  %v1955_v44 = vrot.slane %v476_v39, %v432_v40  ;;  %v1960_v45 = vrot.slane %v425_v43, %v1946_v38  ;;  %v1967_v46 = vrot.slane %v425_v43, %v432_v40  ;;  %s333_s17 = scalar_lea.vmem [#allocation13], %s1131_s7  ;;  %s1156_s15 = sshll.u32 %s1677_s27, 9 }
  0xbc   : > { %1135 = vmatmul.mubr.msk.bf16.vlgmr.msra.gmra.mrb[0].mxu1 %vm362_vm1, %v337_v10  ;;  %vm348_vm11 = vcmp.lt.s32.totalorder %v1971_v47, 240  ;;  %vm422_vm3 = vcmp.lt.s32.totalorder %v1949_v41, 17  ;;  %s991_s10 = sshll.u32 %s333_s17, 4  ;;  %s977_s27 = scalar_lea.sflag [#allocation4], %s1890_s14  ;;  %s2274_s10 = int_to_ptr.vmem [resolvable:$true] %s991_s10 }
  0xbd   : > { %1142 = vmatmul.mubr.msk.bf16.vlgmr.msra.gmra.mrb[0].mxu0 %vm362_vm1, %v337_v10  ;;  %703 = vmatprep.mubr.bf16.mxu1 %v1610_v0  ;;  %vm485_vm5 = vcmp.ne.s32.totalorder %v1952_v42, 0  ;;  %vm486_vm6 = vcmp.ne.s32.totalorder %v1955_v44, 0  ;;  %vm434_vm8 = vcmp.ne.s32.totalorder %v1960_v45, 0  ;;  %vm435_vm10 = vcmp.ne.s32.totalorder %v1967_v46, 0  ;;  %p2367_p10 = scmp.ne.s32.totalorder %s2339_s26, 0 }
  0xbe   : > { %956 = vmatprep.mubr.bf16.mxu0 %v1610_v0  ;;  %vm487_vm7 = vmand %vm345_vm4, %vm485_vm5  ;;  %v490_v49 = vsel %vm486_vm6, 1, %v1610_v0  ;;  %v439_v53 = vsel %vm435_vm10, 1, %v1610_v0  ;;  %vm458_vm1 = vcmp.lt.s32.totalorder %v1949_v41, 16  ;;  %v2020_v7 = vsel %vm434_vm8, 1, %v1610_v0 }
  0xbf   : > { %v489_v48 = vsel %vm487_vm7, 1, %v1610_v0  ;;  %vm436_vm9 = vmand %vm345_vm4, %vm434_vm8  ;;  %v498_v51 = vrot.slane %v490_v49, %v1946_v38  ;;  %v447_v60 = vrot.slane %v439_v53, %v1946_v38  ;;  %v2065_v37 = vsel %vm485_vm5, 1, %v1610_v0 }
  0xc0   : > { %v494_v50 = vrot.slane %v489_v48, %v1946_v38  ;;  %v438_v52 = vsel %vm436_vm9, 1, %v1610_v0  ;;  %vm1990_vm13 = vmand %vm348_vm11, %vm435_vm10  ;;  %vm512_vm9 = vcmp.eq.s32.totalorder %v1960_v45, 1  ;;  %vm513_vm10 = vcmp.eq.s32.totalorder %v1967_v46, 1 }
  0xc1   : > { %vm1998_vm15 = vcmp.eq.s32.totalorder %v498_v51, 1  ;;  %v443_v57 = vrot.slane %v438_v52, %v1946_v38  ;;  %vm581_vm2 = vmand %vm348_vm11, %vm486_vm6  ;;  %vm509_vm6 = vcmp.lt.s32.totalorder %v1949_v41, 1  ;;  %v2025_v8 = vsel %vm1990_vm13, 1, %v1610_v0 }
  0xc2   : > { %vm1994_vm14 = vcmp.eq.s32.totalorder %v494_v50, 1  ;;  %v2028_v9 = vsel %vm581_vm2, 1, %v1610_v0  ;;  %vm2050_vm8 = vcmp.eq.s32.totalorder %v447_v60, 1  ;;  %vm524_vm13 = vcmp.lt.s32.totalorder %v1949_v41, 127 }
  0xc3   : > { %vm2040_vm7 = vcmp.eq.s32.totalorder %v443_v57, 1  ;;  %vm527_vm5 = vcmp.eq.s32.totalorder %v1952_v42, 1 }
 0x137   : > { %v355_v11 = vpop.permute.xlu0 %354 }
 0x18f   : > { %v407_v12 = vpop.f32.mrb[0].mxu1 }
 0x190   : > { %v769_v13 = vpop.f32.mrb[0].mxu0  ;;  %v408_v14 = vadd.f32 %v407_v12, %v355_v11  ;;  %v409_v16 = vpop.f32.mrb[1].mxu1 }
 0x191   : > { %v770_v15 = vadd.f32 %v769_v13, %v355_v11  ;;  %v771_v17 = vpop.f32.mrb[1].mxu0  ;;  %v410_v18 = vadd.f32 %v409_v16, %v355_v11  ;;  %v411_v20 = vpop.f32.mrb[2].mxu1 }
 0x192   : > { %v772_v19 = vadd.f32 %v771_v17, %v355_v11  ;;  %v773_v21 = vpop.f32.mrb[2].mxu0  ;;  %v414_v22 = vmul.f32 0.1, %v408_v14  ;;  %v412_v24 = vpop.f32.mrb[3].mxu1 }
 0x193   : > { %v776_v23 = vmul.f32 0.1, %v770_v15  ;;  %v774_v25 = vpop.f32.mrb[3].mxu0  ;;  %v415_v26 = vmul.f32 0.1, %v410_v18  ;;  %v551_v24 = vrot.slane %v2025_v8, %v1946_v38 }
 0x194   : > { %v777_v27 = vmul.f32 0.1, %v772_v19  ;;  %v1932_v28 = vmax.f32 %v408_v14, %v414_v22  ;;  %v591_v25 = vrot.slane %v2028_v9, %v1946_v38 }
 0x195   : > { %v1934_v29 = vmax.f32 %v770_v15, %v776_v23  ;;  %v1936_v30 = vmax.f32 %v410_v18, %v415_v26  ;;  %v547_v23 = vrot.slane %v2020_v7, %v1946_v38  ;;  %vm2131_vm2 = vcmp.eq.s32.totalorder %v551_v24, 1 }
 0x196   : > { %v1938_v31 = vmax.f32 %v772_v19, %v777_v27  ;;  %v518_v62 = vpack.c.bf16 %v1932_v28, %v1932_v28 }
 0x197   : > { %v1272_v32 = vpack.i.bf16 %v1936_v30, %v1932_v28  ;;  %v519_v61 = vpack.c.bf16 %v1936_v30, %v1936_v30  ;;  %v820_v63 = vpack.c.bf16 %v1934_v29, %v1934_v29 }
 0x198   : > { %v1277_v33 = vpack.i.bf16 %v1938_v31, %v1934_v29  ;;  %v821_v10 = vpack.c.bf16 %v1938_v31, %v1938_v31 }
 0x199   : > { %1273 = vrot.lane.b32.xlu1 %v1272_v32, %s1611_s28  ;;  %1268 = vrot.lane.b32.xlu0 %v1272_v32, %s1612_s12 }
 0x19d   : > { %1278 = vrot.lane.b32.xlu1 %v1277_v33, %s1612_s12  ;;  %1283 = vrot.lane.b32.xlu0 %v1277_v33, %s1611_s28  ;;  %s2279_s28 = scalar_lea.hbm %s2330_s6, %s1156_s15 }
 0x1a1   : > { %1288 = vrot.lane.b32.xlu1 %v1272_v32, %s1613_s19  ;;  %1293 = vrot.lane.b32.xlu0 %v1272_v32, %s1614_s25 }
 0x1a5   : > { %1298 = vrot.lane.b32.xlu1 %v1277_v33, %s1613_s19  ;;  %1303 = vrot.lane.b32.xlu0 %v1277_v33, %s1614_s25  ;;  %s1522_s19 = scalar_lea.vmem %s2274_s10, 512  ;;  %s1619_s25 = smov [#allocation13]  }
 0x1a6   : > { %p1523_p7 = scmp.ne.s32.totalorder %s2274_s10, %s1522_s19 }
 0x1a8   : > { %p1524_p12 = pnand %p1523_p7, %p2367_p10 }
 0x1a9   : > { %1308 = vrot.lane.b32.xlu1 %v1272_v32, %s1615_s11  ;;  %1313 = vrot.lane.b32.xlu0 %v1277_v33, %s1615_s11  ;;  %s1526_s11 = sshll.u32 %s1619_s25, 4  ;;  %s1527_s11 = int_to_ptr.vmem [resolvable:$false] %s1526_s11 }
 0x1aa   : > { %p1525_p13 = pneg %p1524_p12  ;;  %p1529_p1 = scmp.lt.s32.totalorder %s2274_s10, %s1527_s11 }
 0x1ad   : > { %1318 = vrot.lane.b32.xlu1 %v1272_v32, %s1616_s29  ;;  %1323 = vrot.lane.b32.xlu0 %v1277_v33, %s1616_s29  ;;  %s1528_s29 = scalar_lea.vmem %s1527_s11, 1024 }
 0x1ae   : > { %p1530_p3 = scmp.lt.s32.totalorder %s1528_s29, %s1522_s19 }
 0x1b0   : > { %p1531_p2 = por %p1530_p3, %p1529_p1 }
 0x1b1   : > { %1328 = vrot.lane.b32.xlu1 %v1272_v32, %s1617_s18  ;;  %1333 = vrot.lane.b32.xlu0 %v1277_v33, %s1617_s18 }
 0x1b2   : > { %p1532_p8 = pnand %p1531_p2, %p1525_p13 }
 0x1b5   : > { %1338 = vrot.lane.b32.xlu1 %v1272_v32, %s1618_s20  ;;  %1343 = vrot.lane.b32.xlu0 %v1277_v33, %s1618_s20 }
 0x1b9   : > { %658 = vperm.xlu1 %1347, %v340_v34  }
 0x20b   : > { %v1274_v58 = vpop.permute.xlu1 %1273  ;;  %v1269_v59 = vpop.permute.xlu0 %1268 }
 0x20c   : > { %v1276_v3 = vunpack.i.h.bf16 %v1274_v58  ;;  %v1275_v4 = vunpack.i.l.bf16 %v1274_v58  ;;  %v1271_v5 = vunpack.i.h.bf16 %v1269_v59  ;;  %v1270_v6 = vunpack.i.l.bf16 %v1269_v59 }
 0x20d   : > { %v587_v59 = vrot.slane %v2065_v37, %v1946_v38 }
 0x20e   : > { %v474_v11 = vsel %vm473_vm12, %v1275_v4, %v1276_v3  ;;  %v475_v12 = vsel %vm473_vm12, %v1276_v3, %v1275_v4  ;;  %v459_v13 = vsel %vm458_vm1, %v1270_v6, %v1271_v5  ;;  %v460_v14 = vsel %vm458_vm1, %v1271_v5, %v1270_v6 }
 0x20f   : > { %v501_v16 = vsel %vm1994_vm14, %v475_v12, 0.0  ;;  %v502_v17 = vsel %vm1998_vm15, %v474_v11, 0.0  ;;  %v465_v18 = vsel %vm345_vm4, %v460_v14, 0.0  ;;  %v1279_v19 = vpop.permute.xlu1 %1278  ;;  %v1284_v20 = vpop.permute.xlu0 %1283  ;;  %v468_v26 = vpack.c.bf16 %v459_v13, %v459_v13 }
 0x210   : > { %v1281_v22 = vunpack.i.h.bf16 %v1279_v19  ;;  %v1280_v27 = vunpack.i.l.bf16 %v1279_v19  ;;  %v1286_v32 = vunpack.i.h.bf16 %v1284_v20  ;;  %v1285_v33 = vunpack.i.l.bf16 %v1284_v20 }
 0x211   : > { %v503_v34 = vpack.c.bf16 %v501_v16, %v501_v16  ;;  %v504_v35 = vpack.c.bf16 %v502_v17, %v502_v17  ;;  %v467_v36 = vpack.c.bf16 %v465_v18, %v465_v18  ;;  %v601_v54 = vrot.slane %v468_v26, 6 }
 0x212   : > { %v794_v39 = vsel %vm458_vm1, %v1280_v27, %v1281_v22  ;;  %v795_v40 = vsel %vm458_vm1, %v1281_v22, %v1280_v27  ;;  %v804_v43 = vsel %vm473_vm12, %v1285_v33, %v1286_v32  ;;  %v805_v48 = vsel %vm473_vm12, %v1286_v32, %v1285_v33 }
 0x213   : > { %v1289_v49 = vpop.permute.xlu1 %1288  ;;  %v1294_v50 = vpop.permute.xlu0 %1293  ;;  %v796_v0 = vsel %vm345_vm4, %v795_v40, 0.0  ;;  %v799_v51 = vpack.c.bf16 %v794_v39, %v794_v39  ;;  %v806_v52 = vsel %vm1994_vm14, %v805_v48, 0.0  ;;  %v807_v53 = vsel %vm1998_vm15, %v804_v43, 0.0 }
 0x214   : > { %v798_v57 = vpack.c.bf16 %v796_v0, %v796_v0  ;;  %v1291_v58 = vunpack.i.h.bf16 %v1289_v49  ;;  %v808_v60 = vpack.c.bf16 %v806_v52, %v806_v52  ;;  %v1290_v3 = vunpack.i.l.bf16 %v1289_v49 }
 0x215   : > { %v1296_v4 = vunpack.i.h.bf16 %v1294_v50  ;;  %v1295_v5 = vunpack.i.l.bf16 %v1294_v50  ;;  %vm528_vm4 = vcmp.eq.s32.totalorder %v1955_v44, 1  ;;  %vm622_vm12 = vcmask 1041408  }
 0x216   : > { %v2086_v55 = vrot.slane %v503_v34, 4  ;;  %v605_v6 = vrot.slane %v504_v35, 4  ;;  %v600_v56 = vrot.slane %v467_v36, 6  ;;  %v809_v11 = vpack.c.bf16 %v807_v53, %v807_v53 }
 0x217   : > { %v1299_v12 = vpop.permute.xlu1 %1298  ;;  %v1304_v13 = vpop.permute.xlu0 %1303  ;;  %v2088_v14 = vrot.slane %v799_v51, 6  ;;  %v423_v16 = vsel %vm422_vm3, %v1290_v3, %v1291_v58  ;;  %v424_v17 = vsel %vm422_vm3, %v1291_v58, %v1290_v3  ;;  %v511_v18 = vsel %vm509_vm6, %v1296_v4, %v1295_v5 }
 0x218   : > { %v2096_v19 = vrot.slane %v798_v57, 6  ;;  %v450_v20 = vsel %vm2040_vm7, %v424_v17, 0.0  ;;  %v451_v22 = vsel %vm2050_vm8, %v423_v16, 0.0  ;;  %v1301_v26 = vunpack.i.h.bf16 %v1299_v12 }
 0x219   : > { %vm633_vm14 = vcmask 1045504   ;;  %v2102_v27 = vrot.slane %v808_v60, 4  ;;  %v510_v32 = vsel %vm509_vm6, %v1295_v5, %v1296_v4  ;;  %v514_v33 = vsel %vm512_vm9, %v511_v18, 0.0 }
 0x21a   : > { %v1300_v34 = vunpack.i.l.bf16 %v1299_v12  ;;  %v452_v35 = vpack.c.bf16 %v450_v20, %v450_v20  ;;  %v453_v36 = vpack.c.bf16 %v451_v22, %v451_v22  ;;  %v1306_v39 = vunpack.i.h.bf16 %v1304_v13 }
 0x21b   : > { %v1305_v40 = vunpack.i.l.bf16 %v1304_v13  ;;  %v1309_v43 = vpop.permute.xlu1 %1308  ;;  %v1314_v48 = vpop.permute.xlu0 %1313  ;;  %vm537_vm15 = vcmp.lt.s32.totalorder %v1949_v41, 113  ;;  %v516_v52 = vpack.c.bf16 %v514_v33, %v514_v33  ;;  %v515_v58 = vsel %vm513_vm10, %v510_v32, 0.0 }
 0x21c   : > { %v784_v49 = vsel %vm422_vm3, %v1300_v34, %v1301_v26  ;;  %v785_v50 = vsel %vm422_vm3, %v1301_v26, %v1300_v34  ;;  %v1311_v0 = vunpack.i.h.bf16 %v1309_v43  ;;  %v1310_v51 = vunpack.i.l.bf16 %v1309_v43 }
 0x21d   : > { %v2115_v53 = vsel %vm2040_vm7, %v785_v50, 0.0  ;;  %v815_v57 = vsel %vm509_vm6, %v1306_v39, %v1305_v40  ;;  %vm2124_vm1 = vcmp.eq.s32.totalorder %v547_v23, 1  ;;  %v869_v3 = vrot.slane %v809_v11, 4 }
 0x21e   : > { %v787_v4 = vsel %vm2050_vm8, %v784_v49, 0.0  ;;  %v814_v5 = vsel %vm509_vm6, %v1305_v40, %v1306_v39  ;;  %v525_v7 = vsel %vm524_vm13, %v1310_v51, %v1311_v0  ;;  %v788_v23 = vpack.c.bf16 %v2115_v53, %v2115_v53 }
 0x21f   : > { %v526_v8 = vsel %vm524_vm13, %v1311_v0, %v1310_v51  ;;  %v529_v24 = vsel %vm527_vm5, %v525_v7, 0.0  ;;  %v1316_v12 = vunpack.i.h.bf16 %v1314_v48  ;;  %v1319_v11 = vpop.permute.xlu1 %1318  ;;  %v1324_v13 = vpop.permute.xlu0 %1323  ;;  %v816_v21 = vsel %vm512_vm9, %v815_v57, 0.0 }
 0x220   : > { %v531_v16 = vpack.c.bf16 %v529_v24, %v529_v24  ;;  %v1315_v17 = vunpack.i.l.bf16 %v1314_v48  ;;  %v517_v18 = vpack.c.bf16 %v515_v58, %v515_v58  ;;  %v530_v20 = vsel %vm528_vm4, %v526_v8, 0.0 }
 0x221   : > { %v628_v22 = vsel %vm622_vm12, %v453_v36, %v601_v54  ;;  %v608_v26 = vrot.slane %v516_v52, 2  ;;  %v625_v32 = vsel %vm622_vm12, %v452_v35, %v600_v56  ;;  %v789_v33 = vpack.c.bf16 %v787_v4, %v787_v4 }
 0x222   : > { %v826_v34 = vsel %vm524_vm13, %v1315_v17, %v1316_v12  ;;  %v827_v39 = vsel %vm524_vm13, %v1316_v12, %v1315_v17  ;;  %v609_v45 = vrot.slane %v517_v18, 2  ;;  %v818_v40 = vpack.c.bf16 %v816_v21, %v816_v21 }
 0x223   : > { %v828_v43 = vsel %vm527_vm5, %v826_v34, 0.0  ;;  %v829_v48 = vsel %vm528_vm4, %v827_v39, 0.0  ;;  %v632_v54 = vsel %vm366_vm0, %v628_v22, %v605_v6  ;;  %v532_v36 = vpack.c.bf16 %v530_v20, %v530_v20  ;;  %v1329_v44 = vpop.permute.xlu1 %1328  ;;  %v1334_v52 = vpop.permute.xlu0 %1333 }
 0x224   : > { %v2162_v49 = vrot.slane %v531_v16, 6  ;;  %v638_v56 = vsel %vm633_vm14, %v632_v54, %v609_v45  ;;  %v630_v35 = vsel %vm366_vm0, %v625_v32, %v2086_v55  ;;  %vm562_vm3 = vcmp.lt.s32.totalorder %v1949_v41, 112 }
 0x225   : > { %671 = vmatprep.subr.bf16.mxu1 %v638_v56  ;;  %v635_v50 = vsel %vm633_vm14, %v630_v35, %v608_v26  ;;  %v1321_v42 = vunpack.i.h.bf16 %v1319_v11  ;;  %v1320_v0 = vunpack.i.l.bf16 %v1319_v11  ;;  %v1326_v51 = vunpack.i.h.bf16 %v1324_v13 }
 0x226   : > { %v830_v53 = vpack.c.bf16 %v828_v43, %v828_v43  ;;  %v831_v6 = vpack.c.bf16 %v829_v48, %v829_v48  ;;  %672 = vmatpush1.bf16.msra.mxu1 %v635_v50  ;;  %v1325_v57 = vunpack.i.l.bf16 %v1324_v13  ;;  %v817_v58 = vsel %vm513_vm10, %v814_v5, 0.0 }
 0x227   : > { %vm577_vm6 = vcmp.lt.s32.totalorder %v1949_v41, 111  ;;  %v538_v55 = vsel %vm537_vm15, %v1320_v0, %v1321_v42  ;;  %v539_v4 = vsel %vm537_vm15, %v1321_v42, %v1320_v0  ;;  %v819_v7 = vpack.c.bf16 %v817_v58, %v817_v58  ;;  %v1344_v34 = vpop.permute.xlu0 %1343 }
 0x228   : > { %v891_v8 = vsel %vm622_vm12, %v789_v33, %v2088_v14  ;;  %vm2181_vm7 = vcmp.eq.s32.totalorder %v591_v25, 1  ;;  %v554_v46 = vsel %vm2124_vm1, %v538_v55, 0.0  ;;  %v555_v5 = vsel %vm2131_vm2, %v539_v4, 0.0  ;;  %v1339_v33 = vpop.permute.xlu1 %1338 }
 0x229   : > { %v836_v12 = vsel %vm537_vm15, %v1325_v57, %v1326_v51  ;;  %v837_v11 = vsel %vm537_vm15, %v1326_v51, %v1325_v57  ;;  %v613_v14 = vrot.slane %v532_v36, 6  ;;  %v556_v13 = vpack.c.bf16 %v554_v46, %v554_v46 }
 0x22a   : > { %v838_v9 = vsel %vm2124_vm1, %v836_v12, 0.0  ;;  %v839_v25 = vsel %vm2131_vm2, %v837_v11, 0.0  ;;  %v876_v21 = vrot.slane %v830_v53, 6  ;;  %v877_v16 = vrot.slane %v831_v6, 6 }
 0x22b   : > { %v873_v17 = vrot.slane %v819_v7, 2  ;;  %v895_v18 = vsel %vm366_vm0, %v891_v8, %v869_v3  ;;  %v557_v20 = vpack.c.bf16 %v555_v5, %v555_v5  ;;  %v840_v22 = vpack.c.bf16 %v838_v9, %v838_v9 }
 0x22c   : > { %v872_v26 = vrot.slane %v818_v40, 2  ;;  %v888_v32 = vsel %vm622_vm12, %v788_v23, %v2096_v19  ;;  %v616_v39 = vrot.slane %v556_v13, 4  ;;  %v841_v45 = vpack.c.bf16 %v839_v25, %v839_v25 }
 0x22d   : > { %v900_v60 = vsel %vm633_vm14, %v895_v18, %v873_v17  ;;  %v893_v15 = vsel %vm366_vm0, %v888_v32, %v2102_v27  ;;  %vm2206_vm8 = vcmp.eq.s32.totalorder %v587_v59, 1  ;;  %v1331_v19 = vunpack.i.h.bf16 %v1329_v44 }
 0x22e   : > { %924 = vmatprep.subr.bf16.mxu0 %v900_v60  ;;  %v897_v40 = vsel %vm633_vm14, %v893_v15, %v872_v26  ;;  %v1330_v23 = vunpack.i.l.bf16 %v1329_v44  ;;  %v1336_v43 = vunpack.i.h.bf16 %v1334_v52  ;;  %v1335_v48 = vunpack.i.l.bf16 %v1334_v52 }
 0x22f   : > { %925 = vmatpush1.bf16.msra.mxu0 %v897_v40  ;;  %v1341_v54 = vunpack.i.h.bf16 %v1339_v33  ;;  %v1340_v36 = vunpack.i.l.bf16 %v1339_v33  ;;  %v1346_v56 = vunpack.i.h.bf16 %v1344_v34  ;;  %v617_v35 = vrot.slane %v557_v20, 4 }
 0x230   : > { %v563_v27 = vsel %vm562_vm3, %v1330_v23, %v1331_v19  ;;  %v564_v38 = vsel %vm562_vm3, %v1331_v19, %v1330_v23  ;;  %v1345_v37 = vunpack.i.l.bf16 %v1344_v34  ;;  %v880_v59 = vrot.slane %v840_v22, 4  ;;  %v338_v22 = vld [vmem:[#allocation8] sm:$0xf] }
 0x231   : > { %v571_v50 = vpack.c.bf16 %v563_v27, %v563_v27  ;;  %v846_v42 = vsel %vm562_vm3, %v1335_v48, %v1336_v43  ;;  %v847_v0 = vsel %vm562_vm3, %v1336_v43, %v1335_v48  ;;  %v881_v51 = vrot.slane %v841_v45, 4 }
 0x232   : > { %v850_v44 = vpack.c.bf16 %v846_v42, %v846_v42  ;;  %v857_v52 = vsel %vm577_vm6, %v1346_v56, %v1345_v37  ;;  %v645_v53 = vsel %vm622_vm12, %v519_v61, %v613_v14  ;;  %v578_v6 = vsel %vm577_vm6, %v1340_v36, %v1341_v54 }
 0x233   : > { %v579_v57 = vsel %vm577_vm6, %v1341_v54, %v1340_v36  ;;  %v859_v58 = vsel %vm2181_vm7, %v857_v52, 0.0  ;;  %v570_v55 = vsel %vm348_vm11, %v564_v38, 0.0  ;;  %v620_v4 = vrot.slane %v571_v50, 2 }
 0x234   : > { %v856_v7 = vsel %vm577_vm6, %v1345_v37, %v1346_v56  ;;  %v572_v8 = vpack.c.bf16 %v570_v55, %v570_v55  ;;  %v849_v30 = vsel %vm348_vm11, %v847_v0, 0.0  ;;  %v884_v61 = vrot.slane %v850_v44, 2 }
 0x235   : > { %v861_v46 = vpack.c.bf16 %v859_v58, %v859_v58  ;;  %v649_v5 = vsel %vm366_vm0, %v645_v53, %v617_v35  ;;  %v851_v12 = vpack.c.bf16 %v849_v30, %v849_v30  ;;  %v907_v14 = vsel %vm622_vm12, %v821_v10, %v877_v16 }
 0x236   : > { %v621_v11 = vrot.slane %v572_v8, 2  ;;  %v642_v41 = vsel %vm622_vm12, %v518_v62, %v2162_v49  ;;  %v904_v47 = vsel %vm622_vm12, %v820_v63, %v876_v21  ;;  %v911_v9 = vsel %vm366_vm0, %v907_v14, %v881_v51 }
 0x237   : > { %v885_v13 = vrot.slane %v851_v12, 2  ;;  %v647_v25 = vsel %vm366_vm0, %v642_v41, %v616_v39  ;;  %v595_v31 = vsel %vm2181_vm7, %v579_v57, 0.0  ;;  %v594_v28 = vsel %vm2206_vm8, %v578_v6, 0.0 }
 0x238   : > { %v654_v10 = vsel %vm633_vm14, %v649_v5, %v621_v11  ;;  %v597_v16 = vpack.c.bf16 %v595_v31, %v595_v31  ;;  %v858_v62 = vsel %vm2206_vm8, %v856_v7, 0.0  ;;  %v651_v63 = vsel %vm633_vm14, %v647_v25, %v620_v4  ;;  %v659_v26 = vpop.permute.xlu1 %658 }
 0x239   : > { %673 = vmatprep.subr.bf16.mxu1 %v654_v10  ;;  %v916_v29 = vsel %vm633_vm14, %v911_v9, %v885_v13  ;;  %v909_v49 = vsel %vm366_vm0, %v904_v47, %v880_v59  ;;  %v596_v21 = vpack.c.bf16 %v594_v28, %v594_v28  ;;  %v860_v17 = vpack.c.bf16 %v858_v62, %v858_v62 }
 0x23a   : > { %926 = vmatprep.subr.bf16.mxu0 %v916_v29  ;;  %674 = vmatpush1.bf16.msra.mxu1 %v651_v63  ;;  %v913_v24 = vsel %vm633_vm14, %v909_v49, %v884_v61  ;;  %vm661_vm11 = vcmask 293888   ;;  %v716_v19 = vunpack.c.l.bf16 %v1914_v1  ;;  %v969_v36 = vunpack.c.l.bf16 %v1916_v2 }
 0x23b   : > { %927 = vmatpush1.bf16.msra.mxu0 %v913_v24  ;;  %1136 = vmatprep.subr.msk.bf16.mxu1 %vm622_vm12, %v597_v16  ;;  %v666_v18 = vsel %vm622_vm12, %v596_v21, 0  ;;  %v919_v20 = vsel %vm622_vm12, %v860_v17, 0  ;;  %v717_v35 = vunpack.c.h.bf16 %v1914_v1  ;;  %v970_v59 = vunpack.c.h.bf16 %v1916_v2 }
 0x23c   : > { %1143 = vmatprep.subr.msk.bf16.mxu0 %vm622_vm12, %v861_v46 }
 0x23e   : > { %676 = vmatpush1.bf16.msra.mxu1 %v666_v18 }
 0x23f   : > { %929 = vmatpush1.bf16.msra.mxu0 %v919_v20 }
 0x241   : > { %1137 = vmatmul.mubr.msk.bf16.vlgmr.msra.gmra.mrb[4].mxu1 %vm661_vm11, %v338_v22 }
 0x242   : > { %1144 = vmatmul.mubr.msk.bf16.vlgmr.msra.gmra.mrb[4].mxu0 %vm661_vm11, %v338_v22 }
 0x314   : > { %v705_v32 = vpop.f32.mrb[4].mxu1 }
 0x315   : > { %v706_v33 = vadd.f32 %v705_v32, %v659_v26  ;;  %v958_v34 = vpop.f32.mrb[4].mxu0  ;;  %v707_v39 = vpop.f32.mrb[5].mxu1 }
 0x316   : > { %v959_v45 = vadd.f32 %v958_v34, %v659_v26  ;;  %v708_v60 = vadd.f32 %v707_v39, %v659_v26  ;;  %v960_v15 = vpop.f32.mrb[5].mxu0  ;;  %v709_v3 = vpop.f32.mrb[6].mxu1 }
 0x317   : > { %v712_v40 = vmul.f32 0.1, %v706_v33  ;;  %v961_v23 = vadd.f32 %v960_v15, %v659_v26  ;;  %v962_v43 = vpop.f32.mrb[6].mxu0  ;;  %v710_v48 = vpop.f32.mrb[7].mxu1 }
 0x318   : > { %v965_v54 = vmul.f32 0.1, %v959_v45  ;;  %v713_v56 = vmul.f32 0.1, %v708_v60  ;;  %v963_v27 = vpop.f32.mrb[7].mxu0 }
 0x319   : > { %v714_v38 = vmax.f32 %v706_v33, %v712_v40  ;;  %v966_v37 = vmul.f32 0.1, %v961_v23 }
 0x31a   : > { %v967_v50 = vmax.f32 %v959_v45, %v965_v54  ;;  %v715_v42 = vmax.f32 %v708_v60, %v713_v56 }
 0x31b   : > { %v718_v0 = vadd.f32 %v716_v19, %v714_v38  ;;  %v968_v51 = vmax.f32 %v961_v23, %v966_v37 }
 0x31c   : > { %v971_v44 = vadd.f32 %v969_v36, %v967_v50  ;;  %v719_v1 = vadd.f32 %v717_v35, %v715_v42 }
 0x31d   : > { %720 = vst [vmem:[%s333_s17] sm:$0xff] %v718_v0  ;;  %v972_v52 = vadd.f32 %v970_v59, %v968_v51 }
 0x31e   : > { %1145 = vst [vmem:[%s333_s17 + $0x10] sm:$0xff] %v971_v44  ;;  %721 = vst [vmem:[%s333_s17 + $0x8] sm:$0xff] %v719_v1 }
 0x31f   : > { %1146 = vst [vmem:[%s333_s17 + $0x18] sm:$0xff] %v972_v52 }
 0x320   : > { %1535 = shalt.err (!%p1532_p8)
}
 0x321   : > { %s1536_s18 = scalar_lea.hbm %s2279_s28, 512  ;;  %s1540_s17 = scalar_lea.hbm %s2330_s6, 1024 }
 0x322   : > { %p1537_p6 = scmp.ne.s32.totalorder %s2279_s28, %s1536_s18  ;;  %p1541_p0 = scmp.lt.u32.totalorder %s2279_s28, %s2330_s6 }
 0x323   : > { %p1542_p5 = scmp.lt.u32.totalorder %s1540_s17, %s1536_s18  ;;  %p1544_p7 = scmp.lt.u32.totalorder %s1536_s18, %s2279_s28 }
 0x324   : > { %p1538_p4 = pnand %p1537_p6, %p2367_p10 }
 0x325   : > { %p1543_p9 = por %p1542_p5, %p1541_p0 }
 0x326   : > { %p1539_p11 = pneg %p1538_p4 }
 0x327   : > { %p1545_p12 = por %p1544_p7, %p1543_p9 }
 0x329   : > { %p1546_p13 = pnand %p1545_p12, %p1539_p11 }
 0x32b   : > { %1549 = shalt.err (!%p1546_p13)
}
 0x32c   : > { %s1620_s13 = smov 256  }
 0x32d   : > { %1179 = dma.vmem_to_hbm [thread:$0]  (%p2367_p10), %s2274_s10, 512, %s2279_s28, %s977_s27, %s1620_s13, %s1620_s13, %s1612_s12  }
 0x32e PF: > { %s1006_s19 = sand.u32 1, %s1588_s21   ;;  %p2368_p1 = scmp.ne.s32.totalorder %s2340_s30, 0 }
 0x32f   : > { %p2369_p3 = scmp.ge.s32.totalorder %s1600_s24, 2  ;;  %s1007_s25 = scalar_lea.sflag [#allocation4], %s1006_s19 }
 0x331   : > { %p1202_p2 = pnand %p2369_p3, %p2368_p1 }
 0x333   : > { %1583 = dma.done.wait (!%p1202_p2), %s1007_s25, 512  }
 0x334   : > { %1585 = vsyncadd (!%p1202_p2), %s1007_s25, 4294966784  ;;  %p22_p8 = scmp.ge.s32.totalorder %s1817_s9, 4   ;;  %s2370_s21 = smov %s1592_s22 }
 0x335   : > { %s2371_s22 = smov %s1596_s23  ;;  %s2372_s23 = smov %s1829_s8 }
 0x336   : > { %s2373_s24 = smov %s1817_s9  ;;  %24 = sbr.rel (!%p22_p8) target bundleno = 8 (0x8), region = 111 }
 0x33d   :  { %1012 = vsyncpa [#allocation3], 1 }
 0x33e   :  { %1014 = vsyncpa [#allocation3 + $0x1], 1 }
 0x33f   :  { %1015 = vsyncpa [#allocation6], 1 }
 0x340   :  { %1016 = vsyncpa [#allocation9], 1 }
 0x341   :  { %1017 = vsyncpa [#allocation12], 1 }
 0x342   :  { %1018 = vsyncpa [#allocation4], 1 }
 0x343   :  { %1020 = vsyncpa [#allocation4 + $0x1], 1 }

</bundles_post_ra>
